<compile_context>
chip_gen: v6e
topology: v6e:2x2x1
jax: 0.10.0
libtpu: 0.0.40
codegen_flags: <defaults>
</compile_context>

<pallas_src>
import jax
import jax.numpy as jnp
from jax.experimental import pallas as pl
from jax.experimental.pallas import tpu as pltpu


def _make_kl_kernel(inv_temp: float):
    """Kernel over one (TM, C) row-block of student/teacher logits."""

    def kernel(s_ref, t_ref, out_ref):
        s = s_ref[...] * inv_temp                     # (TM, C) student logits / T
        t = t_ref[...] * inv_temp                     # (TM, C) teacher logits / T

        # log-softmax of the student (numerically stable).
        s_max = jnp.max(s, axis=-1, keepdims=True)
        s_lse = s_max + jnp.log(jnp.sum(jnp.exp(s - s_max), axis=-1, keepdims=True))
        lp_s = s - s_lse                              # log p_student

        # softmax + log-softmax of the teacher, sharing one exp pass.
        t_max = jnp.max(t, axis=-1, keepdims=True)
        t_shift = t - t_max
        t_exp = jnp.exp(t_shift)
        t_sum = jnp.sum(t_exp, axis=-1, keepdims=True)
        lp_t = t_shift - jnp.log(t_sum)               # log p_teacher
        p_t = t_exp / t_sum                           # p_teacher

        # Partial KL sum for this block (scalar, SMEM).
        out_ref[0, 0] = jnp.sum(p_t * (lp_t - lp_s))

    return kernel


def kl_divergence_loss_pallas(student_logits, teacher_logits, temperature=1.0,
                              block_rows=None):
    """KL distillation loss (reduction='batchmean') * temperature**2."""
    if student_logits.size == 0 or teacher_logits.size == 0:
        return jnp.float32(0.0)

    f32 = jnp.float32
    batch = student_logits.shape[0]                   # 'batchmean' divides by size(0)
    C = student_logits.shape[-1]

    s = student_logits.reshape(-1, C).astype(f32)
    t = teacher_logits.reshape(-1, C).astype(f32)
    M = s.shape[0]

    # Row tile: as many rows as fit ~2 MiB per input block (double-buffered,
    # 2 inputs -> well under scoped VMEM on every TPU generation), capped at
    # 1024 and never larger than the (8-rounded) problem size.
    if block_rows is None:
        tm = (2 * 1024 * 1024) // max(C * 4, 1)
        tm = max(8, min(1024, (tm // 8) * 8))
    else:
        tm = max(8, (int(block_rows) // 8) * 8)
    tm = min(tm, ((M + 7) // 8) * 8)

    Mp = ((M + tm - 1) // tm) * tm
    if Mp != M:
        pad = Mp - M
        # Zero rows -> identical uniform distributions -> exactly 0 KL.
        s = jnp.pad(s, ((0, pad), (0, 0)))
        t = jnp.pad(t, ((0, pad), (0, 0)))
    G = Mp // tm

    kernel = _make_kl_kernel(1.0 / float(temperature))
    in_spec = pl.BlockSpec((tm, C), lambda i: (i, 0))

    partials = pl.pallas_call(
        kernel,
        out_shape=jax.ShapeDtypeStruct((G, 1), f32),
        grid_spec=pltpu.PrefetchScalarGridSpec(
            num_scalar_prefetch=0,
            grid=(G,),
            in_specs=[in_spec, in_spec],
            out_specs=pl.BlockSpec((1, 1), lambda i: (i, 0),
                                   memory_space=pltpu.MemorySpace.SMEM)),
        compiler_params=pltpu.CompilerParams(
            dimension_semantics=("parallel",)),
    )(s, t)

    return jnp.sum(partials) * (float(temperature) ** 2) / batch


# ---------------- pure-JAX reference (mirrors PyTorch semantics) ----------------
def kl_divergence_loss_ref(student_logits, teacher_logits, temperature=1.0):
    if student_logits.size == 0 or teacher_logits.size == 0:
        return jnp.float32(0.0)
    T = float(temperature)
    p_t = jax.nn.softmax(teacher_logits / T, axis=-1)
    lp_t = jax.nn.log_softmax(teacher_logits / T, axis=-1)
    lp_s = jax.nn.log_softmax(student_logits / T, axis=-1)
    loss = jnp.sum(p_t * (lp_t - lp_s)) / student_logits.shape[0]
    return loss * T ** 2


if __name__ == "__main__":
    B, C = 64, 32
    key = jax.random.PRNGKey(0)
    k1, k2 = jax.random.split(key)
    student = jax.random.normal(k1, (B, C), dtype=jnp.float32) * 3.0
    teacher = jax.random.normal(k2, (B, C), dtype=jnp.float32) * 3.0

    # Default temperature (1.0), single-block grid.
    loss1 = kl_divergence_loss_pallas(student, teacher, temperature=1.0)
    jax.block_until_ready(loss1)
    ref1 = kl_divergence_loss_ref(student, teacher, temperature=1.0)
    assert jnp.allclose(loss1, ref1, rtol=1e-4, atol=1e-6), (loss1, ref1)

    # Temperature != 1, small block to exercise a multi-step grid + row padding.
    loss2 = kl_divergence_loss_pallas(student, teacher, temperature=2.0,
                                      block_rows=16)
    jax.block_until_ready(loss2)
    ref2 = kl_divergence_loss_ref(student, teacher, temperature=2.0)
    assert jnp.allclose(loss2, ref2, rtol=1e-4, atol=1e-6), (loss2, ref2)

    print("KERNEL_OK")
</pallas_src>

<mosaic_0001>
module attributes {stable_mosaic.version = 11 : i64} {
  func.func @kernel(%arg0: i32, %arg1: memref<64x32xf32, #tpu.memory_space<vmem>>, %arg2: memref<64x32xf32, #tpu.memory_space<vmem>>, %arg3: memref<1x1xf32, #tpu.memory_space<smem>>) attributes {dimension_semantics = [#tpu.dimension_semantics<parallel>], iteration_bounds = array<i64: 1>, scalar_prefetch = 0 : i64, scratch_operands = 0 : i64, tpu.core_type = #tpu.core_type<tc>, window_params = [{transform_indices = @transform_0, window_bounds = array<i64: 64, 32>}, {transform_indices = @transform_1, window_bounds = array<i64: 64, 32>}, {transform_indices = @transform_2, window_bounds = array<i64: 1, 1>}]} {
    %c0 = arith.constant 0 : index
    %c0_0 = arith.constant 0 : index
    %0 = vector.load %arg1[%c0, %c0_0] : memref<64x32xf32, #tpu.memory_space<vmem>>, vector<64x32xf32>
    %cst = arith.constant 1.000000e+00 : f32
    %1 = vector.broadcast %cst : f32 to vector<64x32xf32>
    %2 = arith.mulf %0, %1 : vector<64x32xf32>
    %c0_1 = arith.constant 0 : index
    %c0_2 = arith.constant 0 : index
    %3 = vector.load %arg2[%c0_1, %c0_2] : memref<64x32xf32, #tpu.memory_space<vmem>>, vector<64x32xf32>
    %cst_3 = arith.constant 1.000000e+00 : f32
    %4 = vector.broadcast %cst_3 : f32 to vector<64x32xf32>
    %5 = arith.mulf %3, %4 : vector<64x32xf32>
    %cst_4 = arith.constant dense<0xFF800000> : vector<64xf32>
    %6 = vector.multi_reduction <maximumf>, %2, %cst_4 [1] : vector<64x32xf32> to vector<64xf32>
    %7 = vector.shape_cast %6 : vector<64xf32> to vector<64x1xf32>
    %8 = vector.broadcast %7 : vector<64x1xf32> to vector<64x32xf32>
    %9 = arith.subf %2, %8 : vector<64x32xf32>
    %10 = math.exp %9 : vector<64x32xf32>
    %cst_5 = arith.constant dense<0.000000e+00> : vector<64xf32>
    %11 = vector.multi_reduction <add>, %10, %cst_5 [1] : vector<64x32xf32> to vector<64xf32>
    %12 = vector.shape_cast %11 : vector<64xf32> to vector<64x1xf32>
    %13 = math.log %12 : vector<64x1xf32>
    %14 = arith.addf %7, %13 : vector<64x1xf32>
    %15 = vector.broadcast %14 : vector<64x1xf32> to vector<64x32xf32>
    %16 = arith.subf %2, %15 : vector<64x32xf32>
    %cst_6 = arith.constant dense<0xFF800000> : vector<64xf32>
    %17 = vector.multi_reduction <maximumf>, %5, %cst_6 [1] : vector<64x32xf32> to vector<64xf32>
    %18 = vector.shape_cast %17 : vector<64xf32> to vector<64x1xf32>
    %19 = vector.broadcast %18 : vector<64x1xf32> to vector<64x32xf32>
    %20 = arith.subf %5, %19 : vector<64x32xf32>
    %21 = math.exp %20 : vector<64x32xf32>
    %cst_7 = arith.constant dense<0.000000e+00> : vector<64xf32>
    %22 = vector.multi_reduction <add>, %21, %cst_7 [1] : vector<64x32xf32> to vector<64xf32>
    %23 = vector.shape_cast %22 : vector<64xf32> to vector<64x1xf32>
    %24 = math.log %23 : vector<64x1xf32>
    %25 = vector.broadcast %24 : vector<64x1xf32> to vector<64x32xf32>
    %26 = arith.subf %20, %25 : vector<64x32xf32>
    %27 = vector.broadcast %23 : vector<64x1xf32> to vector<64x32xf32>
    %28 = arith.divf %21, %27 : vector<64x32xf32>
    %29 = arith.subf %26, %16 : vector<64x32xf32>
    %30 = arith.mulf %28, %29 : vector<64x32xf32>
    %31 = vector.shape_cast %30 : vector<64x32xf32> to vector<1x64x32xf32>
    %cst_8 = arith.constant dense<0.000000e+00> : vector<1xf32>
    %32 = vector.multi_reduction <add>, %31, %cst_8 [1, 2] : vector<1x64x32xf32> to vector<1xf32>
    %33 = vector.shape_cast %32 : vector<1xf32> to vector<1x1x1xf32>
    %34 = vector.extract %33[0, 0, 0] : f32 from vector<1x1x1xf32>
    %c0_9 = arith.constant 0 : index
    %c0_10 = arith.constant 0 : index
    %35 = memref.load %arg3[%c0_9, %c0_10] : memref<1x1xf32, #tpu.memory_space<smem>>
    memref.store %34, %arg3[%c0_9, %c0_10] : memref<1x1xf32, #tpu.memory_space<smem>>
    return
  }
  func.func @transform_0(%arg0: i32) -> (i32, i32) {
    %c0_i32 = arith.constant 0 : i32
    %c0_i32_0 = arith.constant 0 : i32
    return %arg0, %c0_i32 : i32, i32
  }
  func.func @transform_1(%arg0: i32) -> (i32, i32) {
    %c0_i32 = arith.constant 0 : i32
    %c0_i32_0 = arith.constant 0 : i32
    return %arg0, %c0_i32 : i32, i32
  }
  func.func @transform_2(%arg0: i32) -> (i32, i32) {
    %c0_i32 = arith.constant 0 : i32
    %c0_i32_0 = arith.constant 0 : i32
    return %arg0, %c0_i32 : i32, i32
  }
}

</mosaic_0001>

<bundles_post_ra>
// kernel: tpu_custom_call.1
= control target key start
LH: loop header
LB: loop body
LE: loop exit
PB: predicated region body
PF: predicated region fallthrough
CT: control target
= control target key end

     0   :  { %vm28_vm0 = vcmask 261120   ;;  %s652_s0 = inlined_call_operand.vmem [shape: f32[64,32], index: 0, kind: input, shape index: {}]   ;;  %s653_s1 = inlined_call_operand.vmem [shape: f32[64,32], index: 1, kind: input, shape index: {}]   ;;  %s654_s2 = inlined_call_operand.hbm [shape: f32[1,1], index: 2, kind: output, shape index: {}]  }
   0x1   :  { %v412_v0 = vld [vmem:[%s652_s0] sm:$0xff]  ;;  %v417_v1 = vld [vmem:[%s652_s0 + $0x10] sm:$0xff]  ;;  %v422_v2 = vld [vmem:[%s652_s0 + $0x8] sm:$0xff] }
   0x2   :  { %v29_v3 = vsel %vm28_vm0, %v412_v0, -inf  ;;  %v35_v4 = vsel %vm28_vm0, %v417_v1, -inf  ;;  %v20_v5 = vld [vmem:[%s653_s1] sm:$0xff]  ;;  %v32_v6 = vsel %vm28_vm0, %v422_v2, -inf  ;;  %v21_v8 = vld [vmem:[%s653_s1 + $0x8] sm:$0xff]  ;;  %v440_v9 = vld [vmem:[%s652_s0 + $0x18] sm:$0xff] }
   0x3   :  { %30 = vmax.xlane.f32.xlu0 %v29_v3  ;;  %36 = vmax.xlane.f32.xlu1 %v35_v4  ;;  %v133_v7 = vsel %vm28_vm0, %v20_v5, -inf }
   0x4   :  { %7 = vsyncpa [#allocation3], 0  ;;  %v136_v10 = vsel %vm28_vm0, %v21_v8, -inf  ;;  %v38_v11 = vsel %vm28_vm0, %v440_v9, -inf  ;;  %v22_v12 = vld [vmem:[%s653_s1 + $0x10] sm:$0xff]  ;;  %v451_v13 = vld [vmem:[%s652_s0 + $0x20] sm:$0xff] }
   0x5   :  { %v139_v14 = vsel %vm28_vm0, %v22_v12, -inf  ;;  %v41_v15 = vsel %vm28_vm0, %v451_v13, -inf  ;;  %v23_v16 = vld [vmem:[%s653_s1 + $0x18] sm:$0xff]  ;;  %v462_v17 = vld [vmem:[%s652_s0 + $0x28] sm:$0xff]  ;;  %v470_v20 = vld [vmem:[%s653_s1 + $0x20] sm:$0xff] }
   0x6   :  { %v142_v18 = vsel %vm28_vm0, %v23_v16, -inf  ;;  %v44_v19 = vsel %vm28_vm0, %v462_v17, -inf  ;;  %v475_v21 = vld [vmem:[%s652_s0 + $0x30] sm:$0xff]  ;;  %v145_v22 = vsel %vm28_vm0, %v470_v20, -inf  ;;  %v484_v24 = vld [vmem:[%s653_s1 + $0x28] sm:$0xff]  ;;  %v489_v25 = vld [vmem:[%s652_s0 + $0x38] sm:$0xff] }
   0x7   :  { %33 = vmax.xlane.f32.xlu0 %v32_v6  ;;  %134 = vmax.xlane.f32.xlu1 %v133_v7  ;;  %v47_v23 = vsel %vm28_vm0, %v475_v21, -inf  ;;  %v148_v26 = vsel %vm28_vm0, %v484_v24, -inf  ;;  %v50_v27 = vsel %vm28_vm0, %v489_v25, -inf  ;;  %v498_v28 = vld [vmem:[%s653_s1 + $0x30] sm:$0xff]  ;;  %v503_v29 = vld [vmem:[%s653_s1 + $0x38] sm:$0xff]  ;;  %s393_s1 = smov [#allocation2]  }
   0x8   :  { %v151_v30 = vsel %vm28_vm0, %v498_v28, -inf  ;;  %v154_v31 = vsel %vm28_vm0, %v503_v29, -inf }
   0xb   :  { %137 = vmax.xlane.f32.xlu0 %v136_v10  ;;  %39 = vmax.xlane.f32.xlu1 %v38_v11 }
   0xf   :  { %140 = vmax.xlane.f32.xlu0 %v139_v14  ;;  %42 = vmax.xlane.f32.xlu1 %v41_v15 }
  0x13   :  { %143 = vmax.xlane.f32.xlu0 %v142_v18  ;;  %45 = vmax.xlane.f32.xlu1 %v44_v19 }
  0x17   :  { %146 = vmax.xlane.f32.xlu0 %v145_v22  ;;  %48 = vmax.xlane.f32.xlu1 %v47_v23 }
  0x1b   :  { %149 = vmax.xlane.f32.xlu0 %v148_v26  ;;  %51 = vmax.xlane.f32.xlu1 %v50_v27 }
  0x1f   :  { %152 = vmax.xlane.f32.xlu0 %v151_v30  ;;  %155 = vmax.xlane.f32.xlu1 %v154_v31 }
  0x8c   :  { %v509_v32 = vpop.xlane.xlu0 %30  ;;  %v511_v33 = vpop.xlane.xlu1 %36 }
  0x8d   :  { %v53_v34 = vsub.f32 %v412_v0, %v509_v32  ;;  %v55_v35 = vsub.f32 %v417_v1, %v511_v33 }
  0x8f   :  { %v61_v36 = vmul.f32 1.442695, %v53_v34  ;;  %v65_v37 = vmul.f32 1.442695, %v55_v35 }
  0x90   :  { %v517_v38 = vpop.xlane.xlu0 %33  ;;  %v135_v39 = vpop.xlane.xlu1 %134 }
  0x91   :  { %303 = vpow2.f32 %v61_v36  ;;  %v54_v40 = vsub.f32 %v422_v2, %v517_v38  ;;  %v521_v41 = vsub.f32 %v20_v5, %v135_v39 }
  0x92   :  { %305 = vpow2.f32 %v65_v37 }
  0x93   :  { %v63_v42 = vmul.f32 1.442695, %v54_v40  ;;  %v165_v43 = vmul.f32 1.442695, %v521_v41 }
  0x94   :  { %v138_v44 = vpop.xlane.xlu0 %137  ;;  %v524_v45 = vpop.xlane.xlu1 %39 }
  0x95   :  { %307 = vpow2.f32 %v63_v42  ;;  %v526_v46 = vsub.f32 %v21_v8, %v138_v44  ;;  %v56_v47 = vsub.f32 %v440_v9, %v524_v45 }
  0x96   :  { %309 = vpow2.f32 %v165_v43 }
  0x97   :  { %v167_v48 = vmul.f32 1.442695, %v526_v46  ;;  %v67_v49 = vmul.f32 1.442695, %v56_v47 }
  0x98   :  { %v141_v50 = vpop.xlane.xlu0 %140  ;;  %v531_v51 = vpop.xlane.xlu1 %42 }
  0x99   :  { %311 = vpow2.f32 %v167_v48  ;;  %v533_v52 = vsub.f32 %v22_v12, %v141_v50  ;;  %v57_v53 = vsub.f32 %v451_v13, %v531_v51 }
  0x9a   :  { %313 = vpow2.f32 %v67_v49 }
  0x9b   :  { %v169_v54 = vmul.f32 1.442695, %v533_v52  ;;  %v69_v55 = vmul.f32 1.442695, %v57_v53 }
  0x9c   :  { %v144_v56 = vpop.xlane.xlu0 %143  ;;  %v538_v57 = vpop.xlane.xlu1 %45 }
  0x9d   :  { %315 = vpow2.f32 %v169_v54  ;;  %v540_v58 = vsub.f32 %v23_v16, %v144_v56  ;;  %v58_v59 = vsub.f32 %v462_v17, %v538_v57 }
  0x9e   :  { %v304_v60 = vpop.eup %303  ;;  %317 = vpow2.f32 %v69_v55 }
  0x9f   :  { %v306_v61 = vpop.eup %305  ;;  %v171_v62 = vmul.f32 1.442695, %v540_v58  ;;  %v71_v63 = vmul.f32 1.442695, %v58_v59  ;;  %v77_v3 = vsel %vm28_vm0, %v304_v60, 0.0 }
  0xa0   :  { %78 = vadd.xlane.f32.xlu0 %v77_v3  ;;  %v147_v4 = vpop.xlane.xlu0 %146  ;;  %v546_v5 = vpop.xlane.xlu1 %48  ;;  %v83_v8 = vsel %vm28_vm0, %v306_v61, 0.0 }
  0xa1   :  { %319 = vpow2.f32 %v171_v62  ;;  %v549_v6 = vsub.f32 %v470_v20, %v147_v4  ;;  %v59_v7 = vsub.f32 %v475_v21, %v546_v5 }
  0xa2   :  { %v308_v10 = vpop.eup %307  ;;  %321 = vpow2.f32 %v71_v63 }
  0xa3   :  { %v554_v11 = vpop.eup %309  ;;  %v173_v12 = vmul.f32 1.442695, %v549_v6  ;;  %v73_v14 = vmul.f32 1.442695, %v59_v7  ;;  %v80_v15 = vsel %vm28_vm0, %v308_v10, 0.0 }
  0xa4   :  { %84 = vadd.xlane.f32.xlu0 %v83_v8  ;;  %81 = vadd.xlane.f32.xlu1 %v80_v15  ;;  %v150_v16 = vpop.xlane.xlu0 %149  ;;  %v558_v18 = vpop.xlane.xlu1 %51  ;;  %v181_v22 = vsel %vm28_vm0, %v554_v11, 0.0 }
  0xa5   :  { %323 = vpow2.f32 %v173_v12  ;;  %v561_v19 = vsub.f32 %v484_v24, %v150_v16  ;;  %v60_v20 = vsub.f32 %v489_v25, %v558_v18 }
  0xa6   :  { %v567_v23 = vpop.eup %311  ;;  %325 = vpow2.f32 %v73_v14 }
  0xa7   :  { %v314_v26 = vpop.eup %313  ;;  %v175_v27 = vmul.f32 1.442695, %v561_v19  ;;  %v75_v30 = vmul.f32 1.442695, %v60_v20  ;;  %v184_v31 = vsel %vm28_vm0, %v567_v23, 0.0 }
  0xa8   :  { %182 = vadd.xlane.f32.xlu1 %v181_v22  ;;  %185 = vadd.xlane.f32.xlu0 %v184_v31  ;;  %v153_v24 = vpop.xlane.xlu0 %152  ;;  %v156_v34 = vpop.xlane.xlu1 %155  ;;  %v86_v37 = vsel %vm28_vm0, %v314_v26, 0.0 }
  0xa9   :  { %327 = vpow2.f32 %v175_v27  ;;  %v573_v35 = vsub.f32 %v498_v28, %v153_v24  ;;  %v576_v36 = vsub.f32 %v503_v29, %v156_v34 }
  0xaa   :  { %v579_v39 = vpop.eup %315  ;;  %329 = vpow2.f32 %v75_v30 }
  0xab   :  { %v318_v40 = vpop.eup %317  ;;  %v177_v42 = vmul.f32 1.442695, %v573_v35  ;;  %v179_v43 = vmul.f32 1.442695, %v576_v36  ;;  %v187_v44 = vsel %vm28_vm0, %v579_v39, 0.0 }
  0xac   :  { %87 = vadd.xlane.f32.xlu1 %v86_v37  ;;  %188 = vadd.xlane.f32.xlu0 %v187_v44  ;;  %v89_v28 = vsel %vm28_vm0, %v318_v40, 0.0 }
  0xad   :  { %331 = vpow2.f32 %v177_v42 }
  0xae   :  { %v586_v29 = vpop.eup %319  ;;  %333 = vpow2.f32 %v179_v43 }
  0xaf   :  { %v322_v47 = vpop.eup %321  ;;  %v190_v48 = vsel %vm28_vm0, %v586_v29, 0.0 }
  0xb0   :  { %90 = vadd.xlane.f32.xlu1 %v89_v28  ;;  %191 = vadd.xlane.f32.xlu0 %v190_v48  ;;  %v92_v49 = vsel %vm28_vm0, %v322_v47, 0.0 }
  0xb2   :  { %v591_v50 = vpop.eup %323 }
  0xb3   :  { %v326_v53 = vpop.eup %325  ;;  %v193_v54 = vsel %vm28_vm0, %v591_v50, 0.0 }
  0xb4   :  { %93 = vadd.xlane.f32.xlu1 %v92_v49  ;;  %194 = vadd.xlane.f32.xlu0 %v193_v54  ;;  %v95_v55 = vsel %vm28_vm0, %v326_v53, 0.0 }
  0xb6   :  { %v596_v56 = vpop.eup %327 }
  0xb7   :  { %v330_v59 = vpop.eup %329  ;;  %v196_v60 = vsel %vm28_vm0, %v596_v56, 0.0 }
  0xb8   :  { %96 = vadd.xlane.f32.xlu1 %v95_v55  ;;  %197 = vadd.xlane.f32.xlu0 %v196_v60  ;;  %v98_v61 = vsel %vm28_vm0, %v330_v59, 0.0 }
  0xba   :  { %v601_v62 = vpop.eup %331 }
  0xbb   :  { %v603_v63 = vpop.eup %333  ;;  %v199_v3 = vsel %vm28_vm0, %v601_v62, 0.0 }
  0xbc   :  { %99 = vadd.xlane.f32.xlu1 %v98_v61  ;;  %200 = vadd.xlane.f32.xlu0 %v199_v3  ;;  %v202_v4 = vsel %vm28_vm0, %v603_v63, 0.0 }
  0xc0   :  { %203 = vadd.xlane.f32.xlu1 %v202_v4 }
 0x129   :  { %v79_v7 = vpop.xlane.xlu0 %78 }
 0x12a   :  { %335 = vlog2.f32 %v79_v7 }
 0x12d   :  { %v82_v8 = vpop.xlane.xlu1 %81  ;;  %v85_v10 = vpop.xlane.xlu0 %84 }
 0x12e   :  { %337 = vlog2.f32 %v82_v8 }
 0x12f   :  { %339 = vlog2.f32 %v85_v10 }
 0x131   :  { %v183_v12 = vpop.xlane.xlu1 %182  ;;  %v186_v14 = vpop.xlane.xlu0 %185 }
 0x132   :  { %341 = vlog2.f32 %v183_v12 }
 0x133   :  { %343 = vlog2.f32 %v186_v14 }
 0x135   :  { %v88_v15 = vpop.xlane.xlu1 %87  ;;  %v189_v16 = vpop.xlane.xlu0 %188 }
 0x136   :  { %345 = vlog2.f32 %v88_v15 }
 0x137   :  { %347 = vlog2.f32 %v189_v16  ;;  %v336_v26 = vpop.eup %335 }
 0x138   :  { %349 = vrcp.f32 %v183_v12  ;;  %v102_v37 = vmul.f32 0.6931472, %v336_v26 }
 0x139   :  { %v91_v20 = vpop.xlane.xlu1 %90  ;;  %v192_v22 = vpop.xlane.xlu0 %191 }
 0x13a   :  { %351 = vlog2.f32 %v91_v20  ;;  %v117_v54 = vadd.f32 %v102_v37, %v509_v32 }
 0x13b   :  { %353 = vlog2.f32 %v192_v22  ;;  %v338_v27 = vpop.eup %337 }
 0x13c   :  { %355 = vrcp.f32 %v186_v14  ;;  %v340_v24 = vpop.eup %339  ;;  %v104_v40 = vmul.f32 0.6931472, %v338_v27  ;;  %v125_v15 = vsub.f32 %v412_v0, %v117_v54 }
 0x13d   :  { %357 = vrcp.f32 %v189_v16  ;;  %v94_v30 = vpop.xlane.xlu1 %93  ;;  %v195_v31 = vpop.xlane.xlu0 %194  ;;  %v106_v28 = vmul.f32 0.6931472, %v340_v24 }
 0x13e   :  { %359 = vlog2.f32 %v94_v30  ;;  %v118_v55 = vadd.f32 %v104_v40, %v517_v38 }
 0x13f   :  { %v342_v34 = vpop.eup %341  ;;  %361 = vlog2.f32 %v195_v31  ;;  %v119_v4 = vadd.f32 %v106_v28, %v511_v33 }
 0x140   :  { %363 = vrcp.f32 %v192_v22  ;;  %v344_v42 = vpop.eup %343  ;;  %v206_v47 = vmul.f32 0.6931472, %v342_v34  ;;  %v126_v32 = vsub.f32 %v422_v2, %v118_v55 }
 0x141   :  { %365 = vrcp.f32 %v195_v31  ;;  %v97_v43 = vpop.xlane.xlu1 %96  ;;  %v198_v44 = vpop.xlane.xlu0 %197  ;;  %v208_v48 = vmul.f32 0.6931472, %v344_v42 }
 0x142   :  { %367 = vlog2.f32 %v97_v43  ;;  %v221_v7 = vsub.f32 %v521_v41, %v206_v47 }
 0x143   :  { %v346_v49 = vpop.eup %345  ;;  %369 = vlog2.f32 %v198_v44  ;;  %v222_v8 = vsub.f32 %v526_v46, %v208_v48  ;;  %v127_v46 = vsub.f32 %v417_v1, %v119_v4 }
 0x144   :  { %v348_v53 = vpop.eup %347  ;;  %v108_v59 = vmul.f32 0.6931472, %v346_v49  ;;  %371 = vrcp.f32 %v198_v44  ;;  %v245_v27 = vsub.f32 %v221_v7, %v125_v15 }
 0x145   :  { %v210_v60 = vmul.f32 0.6931472, %v348_v53  ;;  %v100_v61 = vpop.xlane.xlu1 %99  ;;  %v350_v3 = vpop.eup %349  ;;  %v246_v30 = vsub.f32 %v222_v8, %v126_v32 }
 0x146   :  { %v201_v10 = vpop.xlane.xlu0 %200  ;;  %373 = vlog2.f32 %v100_v61  ;;  %v120_v22 = vadd.f32 %v108_v59, %v524_v45  ;;  %v230_v24 = vmul.f32 %v350_v3, %v554_v11 }
 0x147   :  { %v352_v12 = vpop.eup %351  ;;  %v223_v38 = vsub.f32 %v533_v52, %v210_v60  ;;  %375 = vlog2.f32 %v201_v10 }
 0x148   :  { %v354_v14 = vpop.eup %353  ;;  %v110_v16 = vmul.f32 0.6931472, %v352_v12  ;;  %377 = vrcp.f32 %v201_v10  ;;  %v128_v42 = vsub.f32 %v440_v9, %v120_v22  ;;  %v253_v44 = vmul.f32 %v245_v27, %v230_v24 }
 0x149   :  { %v356_v20 = vpop.eup %355  ;;  %v212_v26 = vmul.f32 0.6931472, %v354_v14  ;;  %v204_v33 = vpop.xlane.xlu1 %203  ;;  %v247_v34 = vsub.f32 %v223_v38, %v127_v46 }
 0x14a   :  { %v358_v41 = vpop.eup %357  ;;  %v121_v0 = vadd.f32 %v110_v16, %v531_v51  ;;  %379 = vlog2.f32 %v204_v33  ;;  %v232_v45 = vmul.f32 %v356_v20, %v567_v23  ;;  %v261_v61 = vsel %vm28_vm0, %v253_v44, 0.0 }
 0x14b   :  { %v360_v31 = vpop.eup %359  ;;  %v224_v2 = vsub.f32 %v540_v58, %v212_v26  ;;  %381 = vrcp.f32 %v204_v33  ;;  %v234_v51 = vmul.f32 %v358_v41, %v579_v39 }
 0x14c   :  { %v362_v52 = vpop.eup %361  ;;  %v112_v37 = vmul.f32 0.6931472, %v360_v31  ;;  %v254_v28 = vmul.f32 %v246_v30, %v232_v45  ;;  %v129_v58 = vsub.f32 %v451_v13, %v121_v0 }
 0x14d   :  { %v364_v40 = vpop.eup %363  ;;  %v214_v1 = vmul.f32 0.6931472, %v362_v52  ;;  %v248_v48 = vsub.f32 %v224_v2, %v128_v42  ;;  %v255_v53 = vmul.f32 %v247_v34, %v234_v51 }
 0x14e   :  { %v366_v43 = vpop.eup %365  ;;  %v122_v11 = vadd.f32 %v112_v37, %v538_v57  ;;  %v236_v9 = vmul.f32 %v364_v40, %v586_v29  ;;  %v262_v39 = vsel %vm28_vm0, %v254_v28, 0.0 }
 0x14f   :  { %v368_v47 = vpop.eup %367  ;;  %v225_v23 = vsub.f32 %v549_v6, %v214_v1  ;;  %v238_v57 = vmul.f32 %v366_v43, %v591_v50  ;;  %v264_v8 = vsel %vm28_vm0, %v255_v53, 0.0  ;;  %v263_v32 = vadd.f32 %v262_v39, %v261_v61 }
 0x150   :  { %v370_v49 = vpop.eup %369  ;;  %v114_v54 = vmul.f32 0.6931472, %v368_v47  ;;  %v256_v3 = vmul.f32 %v248_v48, %v236_v9  ;;  %v130_v13 = vsub.f32 %v462_v17, %v122_v11 }
 0x151   :  { %v249_v55 = vsub.f32 %v225_v23, %v129_v58  ;;  %v216_v59 = vmul.f32 0.6931472, %v370_v49  ;;  %v372_v60 = vpop.eup %371  ;;  %v265_v22 = vadd.f32 %v264_v8, %v263_v32 }
 0x152   :  { %v123_v7 = vadd.f32 %v114_v54, %v546_v5  ;;  %v240_v12 = vmul.f32 %v372_v60, %v596_v56 }
 0x153   :  { %v226_v4 = vsub.f32 %v561_v19, %v216_v59  ;;  %v374_v6 = vpop.eup %373  ;;  %v257_v14 = vmul.f32 %v249_v55, %v238_v57  ;;  %v266_v19 = vsel %vm28_vm0, %v256_v3, 0.0 }
 0x154   :  { %v116_v10 = vmul.f32 0.6931472, %v374_v6  ;;  %v376_v15 = vpop.eup %375  ;;  %v131_v5 = vsub.f32 %v475_v21, %v123_v7  ;;  %v267_v27 = vadd.f32 %v266_v19, %v265_v22 }
 0x155   :  { %v250_v29 = vsub.f32 %v226_v4, %v130_v13  ;;  %v378_v38 = vpop.eup %377  ;;  %v218_v17 = vmul.f32 0.6931472, %v376_v15  ;;  %v268_v41 = vsel %vm28_vm0, %v257_v14, 0.0 }
 0x156   :  { %v124_v16 = vadd.f32 %v116_v10, %v558_v18  ;;  %v242_v46 = vmul.f32 %v378_v38, %v601_v62  ;;  %v269_v2 = vadd.f32 %v268_v41, %v267_v27 }
 0x157   :  { %v258_v20 = vmul.f32 %v250_v29, %v240_v12  ;;  %v380_v50 = vpop.eup %379  ;;  %v227_v26 = vsub.f32 %v573_v35, %v218_v17 }
 0x158   :  { %v220_v33 = vmul.f32 0.6931472, %v380_v50  ;;  %v382_v56 = vpop.eup %381  ;;  %v132_v30 = vsub.f32 %v489_v25, %v124_v16 }
 0x159   :  { %v251_v31 = vsub.f32 %v227_v26, %v131_v5  ;;  %v270_v0 = vsel %vm28_vm0, %v258_v20, 0.0  ;;  %v244_v52 = vmul.f32 %v382_v56, %v603_v63 }
 0x15a   :  { %v228_v18 = vsub.f32 %v576_v36, %v220_v33  ;;  %v271_v35 = vadd.f32 %v270_v0, %v269_v2 }
 0x15b   :  { %v259_v24 = vmul.f32 %v251_v31, %v242_v46 }
 0x15c   :  { %v252_v21 = vsub.f32 %v228_v18, %v132_v30 }
 0x15d   :  { %v272_v34 = vsel %vm28_vm0, %v259_v24, 0.0 }
 0x15e   :  { %v260_v45 = vmul.f32 %v252_v21, %v244_v52  ;;  %v273_v37 = vadd.f32 %v272_v34, %v271_v35 }
 0x160   :  { %v274_v62 = vsel %vm28_vm0, %v260_v45, 0.0 }
 0x161   :  { %v275_v40 = vadd.f32 %v274_v62, %v273_v37 }
 0x163   :  { %276 = vadd.xlane.f32.xlu0 %v275_v40 }
 0x1ec   :  { %v277_v25 = vpop.xlane.xlu0 %276 }
 0x1ed   :  { %v278_v42 = vrot.slane %v277_v25, 4 }
 0x1ef   :  { %v279_v36 = vadd.f32 %v278_v42, %v277_v25 }
 0x1f1   :  { %v280_v1 = vrot.slane %v279_v36, 2 }
 0x1f3   :  { %v281_v43 = vadd.f32 %v280_v1, %v279_v36 }
 0x1f5   :  { %v282_v44 = vrot.slane %v281_v43, 1 }
 0x1f7   :  { %v283_v28 = vadd.f32 %v282_v44, %v281_v43 }
 0x1f9   :  { %300 = vpush %v283_v28 }
 0x22a   :  { %s301_s0 = spop %300 }
 0x22b   :  { %286 = sst [smem:[#allocation2]] %s301_s0 }
 0x22c   :  { %294 = dma.smem_to_hbm %s393_s1, 16, %s654_s2, [#allocation3]  }
 0x22d   :  { %391 = dma.done.wait [#allocation3], 16  }
 0x22e   :  { %392 = vsyncadd [#allocation3], 4294967280 }
 0x22f   :  { %298 = sfence }
 0x230   :  { %299 = vsyncpa [#allocation3], 1 }

</bundles_post_ra>
